<compile_context>
chip_gen: v5e
topology: v5e:2x2
jax: 0.10.0
libtpu: 0.0.40
codegen_flags: <defaults>
</compile_context>

<pallas_src>
import jax
import jax.numpy as jnp
from jax.experimental import pallas as pl
from jax.experimental.pallas import tpu as pltpu


def _round_up(x, m):
    return (x + m - 1) // m * m


def crossnet_kernel(xT_ref, w_ref, cL_ref, beta_ref, o_ref):
    # xT_ref:   (D_pad, TB)  input tile, batch on lanes, features on sublanes
    # w_ref:    (L, D_pad)   cross weights (resident)
    # cL_ref:   (D_pad, 1)   c_L = sum_l bias_l (resident)
    # beta_ref: (L, 1)       beta_l = <c_l, w_l> (resident)
    x0 = xT_ref[...].astype(jnp.float32)                       # (D_pad, TB)
    w = w_ref[...].astype(jnp.float32)                         # (L, D_pad)
    beta = beta_ref[...].astype(jnp.float32)                   # (L, 1)

    # p[l, b] = <w_l, x0[:, b]> -- one small MXU matmul replaces L XLU reductions.
    p = jnp.dot(w, x0, preferred_element_type=jnp.float32)     # (L, TB)

    tb = x0.shape[1]
    a = jnp.ones((1, tb), dtype=jnp.float32)                   # x_l = a_l*x0 + c_l
    for l in range(w.shape[0]):                                # L is small & static
        a = a * (1.0 + p[l:l + 1, :]) + beta[l:l + 1, :]

    # x_L = a_L * x_0 + c_L   (single streaming FMA pass over the tile)
    o_ref[...] = (a * x0 + cL_ref[...].astype(jnp.float32)).astype(o_ref.dtype)


def crossnet_forward(x, kernels, bias, *, block_b=None):
    """x: (B, D); kernels: (L, D, 1); bias: (L, D, 1) -> (B, D)."""
    B, D = x.shape
    L = kernels.shape[0]
    itemsize = jnp.dtype(x.dtype).itemsize

    w = kernels.reshape(L, D).astype(jnp.float32)
    b = bias.reshape(L, D).astype(jnp.float32)

    # Batch-independent precompute for the affine closed form.
    c_prefix = jnp.cumsum(b, axis=0) - b                  # c_l, l = 0..L-1 (c_0 = 0)
    c_final = jnp.sum(b, axis=0)                          # c_L, (D,)
    beta = jnp.sum(c_prefix * w, axis=1, keepdims=True)   # (L, 1)

    # Layout: features -> sublanes (pad to 8), batch -> lanes (pad to 128 / tile).
    D_pad = _round_up(max(D, 1), 8)

    if block_b is None:
        vmem_budget = 12 * 1024 * 1024                    # safe under all default scoped limits
        tb_max = vmem_budget // (4 * D_pad * itemsize)    # 2x in + 2x out double buffers
        tb_max = max(128, (tb_max // 128) * 128)
        block_b = min(2048, tb_max)
    block_b = max(128, _round_up(block_b, 128))
    block_b = min(block_b, _round_up(B, 128))             # don't oversize tiny batches
    B_pad = _round_up(B, block_b)
    grid = (B_pad // block_b,)

    xT = jnp.pad(x.T, ((0, D_pad - D), (0, B_pad - B)))            # (D_pad, B_pad)
    w_p = jnp.pad(w, ((0, 0), (0, D_pad - D)))                     # (L, D_pad)
    cL = jnp.pad(c_final, (0, D_pad - D)).reshape(D_pad, 1)        # (D_pad, 1)

    flops = int(2 * L * D_pad * B_pad + 3 * L * B_pad + 2 * D_pad * B_pad)
    bytes_accessed = int(2 * D_pad * B_pad * itemsize + (2 * L * D_pad + D_pad) * 4)

    out_t = pl.pallas_call(
        crossnet_kernel,
        out_shape=jax.ShapeDtypeStruct((D_pad, B_pad), x.dtype),
        grid=grid,
        in_specs=[
            pl.BlockSpec((D_pad, block_b), lambda i: (0, i)),      # streamed input tile
            pl.BlockSpec((L, D_pad), lambda i: (0, 0)),            # resident weights
            pl.BlockSpec((D_pad, 1), lambda i: (0, 0)),            # resident c_L
            pl.BlockSpec((L, 1), lambda i: (0, 0)),                # resident beta
        ],
        out_specs=pl.BlockSpec((D_pad, block_b), lambda i: (0, i)),
        compiler_params=pltpu.CompilerParams(
            dimension_semantics=("parallel",)),
        cost_estimate=pl.CostEstimate(
            flops=flops, transcendentals=0, bytes_accessed=bytes_accessed),
    )(xT, w_p, cL, beta)

    return out_t[:D, :B].T


def crossnet_reference(x, kernels, bias):
    """Pure-JAX mirror of the PyTorch forward (vector parameterization)."""
    x0 = x[:, :, None]                                             # (B, D, 1)
    x1 = x0
    for l in range(kernels.shape[0]):
        x1_w = jnp.tensordot(x1, kernels[l], axes=([1], [0]))      # (B, 1, 1)
        dot_ = jnp.matmul(x0, x1_w)                                # (B, D, 1)
        x1 = dot_ + bias[l][None, :, :] + x1
    return jnp.squeeze(x1, axis=2)


if __name__ == "__main__":
    key = jax.random.PRNGKey(0)

    # --- Case 1: shapes/init matching the PyTorch module (bias = zeros) ---
    B, D, L = 8, 32, 2
    k_x, k_w, k_x2, k_w2, k_b2 = jax.random.split(key, 5)
    x = jax.random.normal(k_x, (B, D), dtype=jnp.float32)
    xavier_std = jnp.sqrt(2.0 / (D + 1)).astype(jnp.float32)
    kernels = xavier_std * jax.random.normal(k_w, (L, D, 1), dtype=jnp.float32)
    bias = jnp.zeros((L, D, 1), dtype=jnp.float32)

    out = jax.block_until_ready(crossnet_forward(x, kernels, bias))
    ref = crossnet_reference(x, kernels, bias)
    assert out.shape == (B, D)
    assert jnp.allclose(out, ref, atol=1e-5, rtol=1e-5), "mismatch vs reference (case 1)"

    # --- Case 2: non-aligned shapes + nonzero bias (exercises padding & beta/c_L path) ---
    B2, D2, L2 = 37, 21, 3
    x2 = jax.random.normal(k_x2, (B2, D2), dtype=jnp.float32)
    std2 = jnp.sqrt(2.0 / (D2 + 1)).astype(jnp.float32)
    kernels2 = std2 * jax.random.normal(k_w2, (L2, D2, 1), dtype=jnp.float32)
    bias2 = 0.1 * jax.random.normal(k_b2, (L2, D2, 1), dtype=jnp.float32)

    out2 = jax.block_until_ready(crossnet_forward(x2, kernels2, bias2))
    ref2 = crossnet_reference(x2, kernels2, bias2)
    assert out2.shape == (B2, D2)
    assert jnp.allclose(out2, ref2, atol=1e-4, rtol=1e-4), "mismatch vs reference (case 2)"

    print("KERNEL_OK")
</pallas_src>

<mosaic_0001>
module attributes {stable_mosaic.version = 11 : i64} {
  func.func @crossnet_kernel(%arg0: i32, %arg1: memref<32x128xf32, #tpu.memory_space<vmem>>, %arg2: memref<2x32xf32, #tpu.memory_space<vmem>>, %arg3: memref<32x1xf32, #tpu.memory_space<vmem>>, %arg4: memref<2x1xf32, #tpu.memory_space<vmem>>, %arg5: memref<32x128xf32, #tpu.memory_space<vmem>>) attributes {dimension_semantics = [#tpu.dimension_semantics<parallel>], iteration_bounds = array<i64: 1>, scalar_prefetch = 0 : i64, scratch_operands = 0 : i64, tpu.core_type = #tpu.core_type<tc>, window_params = [{transform_indices = @transform_0, window_bounds = array<i64: 32, 128>}, {pipeline_mode = #tpu.pipeline_mode<synchronous>, transform_indices = @transform_1, window_bounds = array<i64: 2, 32>}, {pipeline_mode = #tpu.pipeline_mode<synchronous>, transform_indices = @transform_2, window_bounds = array<i64: 32, 1>}, {pipeline_mode = #tpu.pipeline_mode<synchronous>, transform_indices = @transform_3, window_bounds = array<i64: 2, 1>}, {transform_indices = @transform_4, window_bounds = array<i64: 32, 128>}]} {
    %c0 = arith.constant 0 : index
    %c0_0 = arith.constant 0 : index
    %0 = vector.load %arg1[%c0, %c0_0] : memref<32x128xf32, #tpu.memory_space<vmem>>, vector<32x128xf32>
    %c0_1 = arith.constant 0 : index
    %c0_2 = arith.constant 0 : index
    %1 = vector.load %arg2[%c0_1, %c0_2] : memref<2x32xf32, #tpu.memory_space<vmem>>, vector<2x32xf32>
    %c0_3 = arith.constant 0 : index
    %c0_4 = arith.constant 0 : index
    %2 = vector.load %arg4[%c0_3, %c0_4] : memref<2x1xf32, #tpu.memory_space<vmem>>, vector<2x1xf32>
    %cst = arith.constant dense<0.000000e+00> : vector<2x128xf32>
    %3 = tpu.matmul %1, %0, %cst {dimension_numbers = #tpu.dot_dimension_numbers<[1], [0], [0], [1], [0, 0, 1, 1], [], []>} : vector<2x32xf32>, vector<32x128xf32>, vector<2x128xf32> -> vector<2x128xf32>
    %cst_5 = arith.constant 1.000000e+00 : f32
    %4 = vector.broadcast %cst_5 : f32 to vector<1x128xf32>
    %5 = vector.extract_strided_slice %3 {offsets = [0, 0], sizes = [1, 128], strides = [1, 1]} : vector<2x128xf32> to vector<1x128xf32>
    %cst_6 = arith.constant 1.000000e+00 : f32
    %6 = vector.broadcast %cst_6 : f32 to vector<1x128xf32>
    %7 = arith.addf %6, %5 : vector<1x128xf32>
    %8 = arith.mulf %4, %7 : vector<1x128xf32>
    %9 = vector.extract_strided_slice %2 {offsets = [0, 0], sizes = [1, 1], strides = [1, 1]} : vector<2x1xf32> to vector<1x1xf32>
    %10 = vector.broadcast %9 : vector<1x1xf32> to vector<1x128xf32>
    %11 = arith.addf %8, %10 : vector<1x128xf32>
    %12 = vector.extract_strided_slice %3 {offsets = [1, 0], sizes = [1, 128], strides = [1, 1]} : vector<2x128xf32> to vector<1x128xf32>
    %cst_7 = arith.constant 1.000000e+00 : f32
    %13 = vector.broadcast %cst_7 : f32 to vector<1x128xf32>
    %14 = arith.addf %13, %12 : vector<1x128xf32>
    %15 = arith.mulf %11, %14 : vector<1x128xf32>
    %16 = vector.extract_strided_slice %2 {offsets = [1, 0], sizes = [1, 1], strides = [1, 1]} : vector<2x1xf32> to vector<1x1xf32>
    %17 = vector.broadcast %16 : vector<1x1xf32> to vector<1x128xf32>
    %18 = arith.addf %15, %17 : vector<1x128xf32>
    %19 = vector.broadcast %18 : vector<1x128xf32> to vector<32x128xf32>
    %20 = arith.mulf %19, %0 : vector<32x128xf32>
    %c0_8 = arith.constant 0 : index
    %c0_9 = arith.constant 0 : index
    %21 = vector.load %arg3[%c0_8, %c0_9] : memref<32x1xf32, #tpu.memory_space<vmem>>, vector<32x1xf32>
    %22 = vector.broadcast %21 : vector<32x1xf32> to vector<32x128xf32>
    %23 = arith.addf %20, %22 : vector<32x128xf32>
    %c0_10 = arith.constant 0 : index
    %c0_11 = arith.constant 0 : index
    %24 = vector.load %arg5[%c0_10, %c0_11] : memref<32x128xf32, #tpu.memory_space<vmem>>, vector<32x128xf32>
    tpu.vector_store %arg5[%c0_10, %c0_11], %23 {strides = array<i32>} : memref<32x128xf32, #tpu.memory_space<vmem>>, vector<32x128xf32>,
    return
  }
  func.func @transform_0(%arg0: i32) -> (i32, i32) {
    %c0_i32 = arith.constant 0 : i32
    %c0_i32_0 = arith.constant 0 : i32
    return %c0_i32, %arg0 : i32, i32
  }
  func.func @transform_1(%arg0: i32) -> (i32, i32) {
    %c0_i32 = arith.constant 0 : i32
    %c0_i32_0 = arith.constant 0 : i32
    %c0_i32_1 = arith.constant 0 : i32
    return %c0_i32, %c0_i32_0 : i32, i32
  }
  func.func @transform_2(%arg0: i32) -> (i32, i32) {
    %c0_i32 = arith.constant 0 : i32
    %c0_i32_0 = arith.constant 0 : i32
    %c0_i32_1 = arith.constant 0 : i32
    return %c0_i32, %c0_i32_0 : i32, i32
  }
  func.func @transform_3(%arg0: i32) -> (i32, i32) {
    %c0_i32 = arith.constant 0 : i32
    %c0_i32_0 = arith.constant 0 : i32
    %c0_i32_1 = arith.constant 0 : i32
    return %c0_i32, %c0_i32_0 : i32, i32
  }
  func.func @transform_4(%arg0: i32) -> (i32, i32) {
    %c0_i32 = arith.constant 0 : i32
    %c0_i32_0 = arith.constant 0 : i32
    return %c0_i32, %arg0 : i32, i32
  }
}

</mosaic_0001>

<bundles_post_ra>
// kernel: tpu_custom_call.1
= control target key start
LH: loop header
LB: loop body
LE: loop exit
PB: predicated region body
PF: predicated region fallthrough
CT: control target
= control target key end

     0   :  { %v151_v2 = vmov 0   ;;  %s213_s0 = inlined_call_operand.vmem [shape: f32[32,128], index: 0, kind: input, shape index: {}]   ;;  %s214_s1 = inlined_call_operand.vmem [shape: f32[2,32], index: 1, kind: input, shape index: {}]   ;;  %s215_s2 = inlined_call_operand.vmem [shape: f32[32,1], index: 2, kind: input, shape index: {}]   ;;  %s216_s3 = inlined_call_operand.vmem [shape: f32[2,1], index: 3, kind: input, shape index: {}]   ;;  %s217_s4 = inlined_call_operand.hbm [shape: f32[32,128], index: 4, kind: output, shape index: {}]  }
   0x1   :  { %v21_v0 = vld [vmem:[%s213_s0 + $0x18] sm:$0xff]  ;;  %v20_v1 = vld [vmem:[%s213_s0 + $0x10] sm:$0xff]  ;;  %122 = vset.pattern.permute.xlu0 %v151_v2  ;;  %v23_v3 = vld [vmem:[%s216_s3] sm:$0x3]  ;;  %123 = vset.pattern.permute.xlu1 %v151_v2 }
   0x2   :  { %40 = vmatpush.msra.mxu0 %v21_v0  ;;  %v19_v4 = vld [vmem:[%s213_s0 + $0x8] sm:$0xff]  ;;  %51 = vperm.xlu0 %122, %v23_v3   ;;  %v70_v6 = vld [vmem:[%s215_s2 + $0x18] sm:$0xff] }
   0x3   :  { %v68_v5 = vld [vmem:[%s215_s2 + $0x8] sm:$0xff] }
   0x4   :  { %41 = vmatpush.msra.mxu0 %v20_v1  ;;  %78 = vperm.xlu1 %123, %v68_v5  }
   0x5   :  { %9 = vsyncpa [#allocation3], 0  ;;  %v18_v7 = vld [vmem:[%s213_s0] sm:$0xff]  ;;  %124 = vset.pattern.permute.xlu2 %v151_v2  ;;  %vm24_vm0 = vcmask 261120   ;;  %v69_v10 = vld [vmem:[%s215_s2 + $0x10] sm:$0xff]  ;;  %s152_s0 = smov [#allocation2]  }
   0x6   :  { %42 = vmatpush.msra.mxu0 %v19_v4  ;;  %v22_v8 = vld [vmem:[%s214_s1] sm:$0x3]  ;;  %88 = vperm.xlu2 %124, %v70_v6   ;;  %s103_s1 = sshll.u32 %s152_s0, 4  ;;  %s105_s9 = sshll.u32 %s217_s4, 4  ;;  %s104_s1 = int_to_ptr.vmem [resolvable:$true] %s103_s1  ;;  %s106_s9 = int_to_ptr.hbm [resolvable:$true] %s105_s9 }
   0x7   :  { %v67_v9 = vld [vmem:[%s215_s2] sm:$0xff]  ;;  %s153_s10 = smov 128   ;;  %s154_s11 = smov 8  }
   0x8   :  { %43 = vmatpush.msra.mxu0 %v18_v7 }
   0x9   :  { %117 = vmatmul.msk.f32.vlgmr.msra.gmra.mxu0 %vm24_vm0, %v22_v8 }
   0xa   :  { %73 = vperm.xlu0 %122, %v67_v9  }
   0xc   :  { %83 = vperm.xlu1 %123, %v69_v10  }
  0x60   :  { %v89_v24 = vpop.permute.xlu2 %88 }
  0x74   :  { %v52_v13 = vpop.permute.xlu0 %51 }
  0x75   :  { %v59_v17 = vrot.slane %v52_v13, 1 }
  0x76   :  { %v79_v14 = vpop.permute.xlu1 %78 }
  0x7c   :  { %v74_v26 = vpop.permute.xlu0 %73 }
  0x7e   :  { %v84_v27 = vpop.permute.xlu1 %83 }
  0x86   :  { %v45_v11 = vpop.f32.mrf.mxu0 }
  0x87   :  { %v48_v12 = vadd.f32 1.0, %v45_v11 }
  0x89   :  { %v54_v15 = vadd.f32 %v52_v13, %v48_v12  ;;  %v56_v16 = vrot.slane %v48_v12, 1 }
  0x8b   :  { %v58_v18 = vmul.f32 %v56_v16, %v54_v15 }
  0x8d   :  { %v61_v19 = vadd.f32 %v59_v17, %v58_v18 }
  0x8f   :  { %v62_v20 = vperm.slane %v61_v19, 0 }
  0x91   :  { %v64_v21 = vmul.f32 %v62_v20, %v19_v4  ;;  %v63_v22 = vmul.f32 %v62_v20, %v18_v7  ;;  %v65_v23 = vmul.f32 %v62_v20, %v20_v1  ;;  %v66_v25 = vmul.f32 %v62_v20, %v21_v0 }
  0x93   :  { %v92_v28 = vadd.f32 %v79_v14, %v64_v21  ;;  %v91_v29 = vadd.f32 %v74_v26, %v63_v22  ;;  %v93_v30 = vadd.f32 %v84_v27, %v65_v23  ;;  %v94_v31 = vadd.f32 %v89_v24, %v66_v25 }
  0x95   :  { %96 = vst [vmem:[#allocation2 + $0x8] sm:$0xff] %v92_v28 }
  0x96   :  { %95 = vst [vmem:[#allocation2] sm:$0xff] %v91_v29 }
  0x97   :  { %97 = vst [vmem:[#allocation2 + $0x10] sm:$0xff] %v93_v30 }
  0x98   :  { %98 = vst [vmem:[#allocation2 + $0x18] sm:$0xff] %v94_v31 }
  0x99   :  { %111 = dma.vmem_to_hbm [thread:$0]  %s104_s1, 512, %s106_s9, [#allocation3], %s153_s10, %s153_s10, %s154_s11  }
  0x9a   :  { %149 = dma.done.wait [#allocation3], 512  }
  0x9b   :  { %150 = vsyncadd [#allocation3], 4294966784 }
  0x9c   :  { %116 = vsyncpa [#allocation3], 1 }

</bundles_post_ra>
